<compile_context>
chip_gen: v5e
topology: v5e:2x2
jax: 0.10.0
libtpu: 0.0.40
codegen_flags: <defaults>
</compile_context>

<pallas_src>
import jax
import jax.numpy as jnp
from jax.experimental import pallas as pl
from jax.experimental.pallas import tpu as pltpu


def _mlp_kernel(x_ref,
                w1_ref, b1_ref,
                w23_ref, b23_ref,
                w4t_ref, b4_ref,
                o_ref):
    mm = w1_ref.dtype
    x = x_ref[...].astype(mm)                                   # (TB, dim_x)

    # input: Linear(dim_x, 128p) + ReLU  (bias / ReLU kept in f32)
    h = jnp.dot(x, w1_ref[...], preferred_element_type=jnp.float32) + b1_ref[...]
    h = jnp.maximum(h, 0.0)

    # dense1 o dense2 fused: (h@w2+b2)@w3+b3 == h@(w2@w3) + (b2@w3+b3)
    # (the dropout between them is eval-mode identity); then ReLU.
    h = jnp.dot(h.astype(mm), w23_ref[...],
                preferred_element_type=jnp.float32) + b23_ref[...]
    h = jnp.maximum(h, 0.0)

    # output: Linear(256p, 1) computed lane-dense:
    #   (1, K) contracted with (TB, K) on K  ->  (1, TB) row
    # (last-dim/last-dim contraction, the q@k^T pattern: no materialized
    # transpose of the (TB, 256) activation tile).
    out = jax.lax.dot_general(
        w4t_ref[...], h.astype(mm),
        dimension_numbers=(((1,), (1,)), ((), ())),
        preferred_element_type=jnp.float32)
    o_ref[...] = (out + b4_ref[...]).astype(o_ref.dtype)


def _round_up(n, m):
    return ((n + m - 1) // m) * m


def _pad2d(a, shape, dtype=jnp.float32):
    a = jnp.asarray(a, dtype)
    pads = [(0, t - s) for s, t in zip(a.shape, shape)]
    return jnp.pad(a, pads)


def nn_regressor_forward(x, params, *, batch_tile=4096,
                         matmul_dtype=jnp.bfloat16):
    """x: (B, dim_x) float32.  Returns (B, 1) float32 (eval-mode forward)."""
    B, dim_x = x.shape
    (w1, b1), (w2, b2), (w3, b3), (w4, b4) = params

    H1 = _round_up(w1.shape[1], 128)      # 100 -> 128
    H2 = _round_up(w2.shape[1], 128)      # 200 -> 256

    hi = jax.lax.Precision.HIGHEST

    # Zero-pad weights/biases once to MXU-aligned lane widths (numerically
    # exact: padded lanes get zero weight + zero bias, and ReLU(0) = 0).
    w1p = _pad2d(w1, (dim_x, H1))
    w2p = _pad2d(w2, (H1, H2))
    w3p = _pad2d(w3, (H2, H2))
    b1p = _pad2d(jnp.reshape(b1, (1, -1)), (1, H1))
    b2p = _pad2d(jnp.reshape(b2, (1, -1)), (1, H2))
    b3p = _pad2d(jnp.reshape(b3, (1, -1)), (1, H2))
    b4p = jnp.asarray(b4, jnp.float32).reshape(1, 1)

    # Fuse dense1 -> dense2 (no activation between them in eval mode):
    #   (h@w2 + b2)@w3 + b3  ==  h @ (w2@w3) + (b2@w3 + b3)
    w23 = jnp.dot(w2p, w3p, precision=hi)                       # (H1, H2)
    b23 = jnp.dot(b2p, w3p, precision=hi) + b3p                 # (1, H2)

    # Output weight stored transposed (1, H2) for the lane-dense (1, TB) row.
    w4t = _pad2d(jnp.asarray(w4, jnp.float32).T, (1, H2))

    # Matmul-input dtype (bf16 by default; f32 accumulation inside the kernel,
    # biases stay f32).
    w1p = w1p.astype(matmul_dtype)
    w23 = w23.astype(matmul_dtype)
    w4t = w4t.astype(matmul_dtype)

    # Batch tiling: large, 128-aligned.  Prefer >= 4 grid steps (>= 2 per v7x
    # TensorCore on the "parallel" axis) when the batch is big enough, else
    # >= 2, so the pipeline has prefetch/writeback overlap on every core.
    B128 = _round_up(max(B, 1), 128)
    TB = min(_round_up(int(batch_tile), 128), B128, 8192)
    if B128 >= 4 * 128:
        TB = min(TB, max(128, (B128 // 4) // 128 * 128))
    elif B128 >= 2 * 128:
        TB = min(TB, max(128, (B128 // 2) // 128 * 128))
    B_pad = _round_up(B, TB)
    n_tiles = B_pad // TB

    x = jnp.asarray(x, jnp.float32)
    if B_pad != B:
        x = jnp.pad(x, ((0, B_pad - B), (0, 0)))

    def _full(arr):
        # Entire (small) parameter tensor as a single resident VMEM block.
        return pl.BlockSpec(arr.shape, lambda i: (0, 0))

    params_p = (w1p, b1p, w23, b23, w4t, b4p)
    param_bytes = sum(int(a.size) * a.dtype.itemsize for a in params_p)

    # Scheduling hint for XLA around the custom call (post-fusion arithmetic).
    flops = 2 * B_pad * (dim_x * H1 + H1 * H2 + H2)
    bytes_accessed = 4 * (B_pad * dim_x + B_pad) + param_bytes

    # Explicit VMEM budget: double-buffered x/out tiles + resident params +
    # the f32/bf16 (TB, H1/H2) intermediates, with headroom.  Clamped so it is
    # valid on every generation (v5e/v6e default scoped limit is 16/32 MiB;
    # v7x has 64 MiB physical VMEM per TensorCore).
    mm_bytes = jnp.dtype(matmul_dtype).itemsize
    interm_bytes = TB * ((H1 + H2) * (4 + mm_bytes) + dim_x * mm_bytes)
    est = 2 * (TB * dim_x * 4 + TB * 4 + param_bytes) + interm_bytes
    vmem_limit = int(min(max(2 * est, 32 * 1024 * 1024), 48 * 1024 * 1024))

    out = pl.pallas_call(
        _mlp_kernel,
        out_shape=jax.ShapeDtypeStruct((1, B_pad), jnp.float32),
        grid_spec=pltpu.PrefetchScalarGridSpec(
            num_scalar_prefetch=0,
            grid=(n_tiles,),
            in_specs=[
                pl.BlockSpec((TB, dim_x), lambda i: (i, 0)),   # x batch tile
                _full(w1p), _full(b1p),
                _full(w23), _full(b23),
                _full(w4t), _full(b4p),
            ],
            # Lane-dense output: (1, TB) block of a (1, B_pad) row.
            out_specs=pl.BlockSpec((1, TB), lambda i: (0, i)),
        ),
        compiler_params=pltpu.CompilerParams(
            dimension_semantics=("parallel",),
            vmem_limit_bytes=vmem_limit),
        cost_estimate=pl.CostEstimate(
            flops=int(flops), transcendentals=0,
            bytes_accessed=int(bytes_accessed)),
    )(x, *params_p)

    return out[0, :B].reshape(B, 1)


def init_params(key, dim_x):
    """Deterministic init mirroring torch.nn.Linear (U(-1/sqrt(fan_in), +))."""
    sizes = [(dim_x, 100), (100, 200), (200, 200), (200, 1)]
    params = []
    for fan_in, fan_out in sizes:
        kw, kb, key = jax.random.split(key, 3)
        bound = fan_in ** -0.5
        w = jax.random.uniform(kw, (fan_in, fan_out), jnp.float32, -bound, bound)
        b = jax.random.uniform(kb, (1, fan_out), jnp.float32, -bound, bound)
        params.append((w, b))
    return params


if __name__ == "__main__":
    key = jax.random.PRNGKey(0)
    k_x, k_p = jax.random.split(key)

    dim_x = 16
    params = init_params(k_p, dim_x)

    hi = jax.lax.Precision.HIGHEST

    # Pure-JAX reference of the same (eval-mode) forward pass, full f32.
    def ref_fwd(xx):
        (w1, b1), (w2, b2), (w3, b3), (w4, b4) = params
        h = jnp.maximum(jnp.dot(xx, w1, precision=hi) + b1, 0.0)
        h = jnp.dot(h, w2, precision=hi) + b2
        h = jnp.maximum(jnp.dot(h, w3, precision=hi) + b3, 0.0)
        return jnp.dot(h, w4, precision=hi) + b4

    # Small single-tile batch, f32 matmul path (tight tolerance; the w2@w3
    # fusion only reassociates f32 arithmetic).
    x = jax.random.normal(k_x, (8, dim_x), dtype=jnp.float32)
    y = nn_regressor_forward(x, params, matmul_dtype=jnp.float32)
    jax.block_until_ready(y)
    assert y.shape == (8, 1)
    assert jnp.allclose(y, ref_fwd(x), atol=1e-3, rtol=1e-3), "mismatch (f32 path)"

    # Larger multi-tile batch, default bf16 matmuls with f32 accumulation.
    x2 = jax.random.normal(k_x, (300, dim_x), dtype=jnp.float32)
    y2 = nn_regressor_forward(x2, params)
    jax.block_until_ready(y2)
    assert y2.shape == (300, 1)
    assert jnp.allclose(y2, ref_fwd(x2), atol=3e-2, rtol=3e-2), "mismatch (bf16 path)"

    print("KERNEL_OK")
</pallas_src>

<mosaic_0001>
module attributes {stable_mosaic.version = 11 : i64} {
  func.func @_mlp_kernel(%arg0: i32, %arg1: memref<128x16xf32, #tpu.memory_space<vmem>>, %arg2: memref<16x128xf32, #tpu.memory_space<vmem>>, %arg3: memref<1x128xf32, #tpu.memory_space<vmem>>, %arg4: memref<128x256xf32, #tpu.memory_space<vmem>>, %arg5: memref<1x256xf32, #tpu.memory_space<vmem>>, %arg6: memref<1x256xf32, #tpu.memory_space<vmem>>, %arg7: memref<1x1xf32, #tpu.memory_space<vmem>>, %arg8: memref<1x128xf32, #tpu.memory_space<vmem>>) attributes {dimension_semantics = [#tpu.dimension_semantics<parallel>], iteration_bounds = array<i64: 1>, scalar_prefetch = 0 : i64, scratch_operands = 0 : i64, tpu.core_type = #tpu.core_type<tc>, window_params = [{transform_indices = @transform_0, window_bounds = array<i64: 128, 16>}, {pipeline_mode = #tpu.pipeline_mode<synchronous>, transform_indices = @transform_1, window_bounds = array<i64: 16, 128>}, {pipeline_mode = #tpu.pipeline_mode<synchronous>, transform_indices = @transform_2, window_bounds = array<i64: 1, 128>}, {pipeline_mode = #tpu.pipeline_mode<synchronous>, transform_indices = @transform_3, window_bounds = array<i64: 128, 256>}, {pipeline_mode = #tpu.pipeline_mode<synchronous>, transform_indices = @transform_4, window_bounds = array<i64: 1, 256>}, {pipeline_mode = #tpu.pipeline_mode<synchronous>, transform_indices = @transform_5, window_bounds = array<i64: 1, 256>}, {pipeline_mode = #tpu.pipeline_mode<synchronous>, transform_indices = @transform_6, window_bounds = array<i64: 1, 1>}, {transform_indices = @transform_7, window_bounds = array<i64: 1, 128>}]} {
    %c0 = arith.constant 0 : index
    %c0_0 = arith.constant 0 : index
    %0 = vector.load %arg1[%c0, %c0_0] : memref<128x16xf32, #tpu.memory_space<vmem>>, vector<128x16xf32>
    %c0_1 = arith.constant 0 : index
    %c0_2 = arith.constant 0 : index
    %1 = vector.load %arg2[%c0_1, %c0_2] : memref<16x128xf32, #tpu.memory_space<vmem>>, vector<16x128xf32>
    %cst = arith.constant dense<0.000000e+00> : vector<128x128xf32>
    %2 = tpu.matmul %0, %1, %cst {dimension_numbers = #tpu.dot_dimension_numbers<[1], [0], [0], [1], [0, 0, 1, 1], [], []>} : vector<128x16xf32>, vector<16x128xf32>, vector<128x128xf32> -> vector<128x128xf32>
    %c0_3 = arith.constant 0 : index
    %c0_4 = arith.constant 0 : index
    %3 = vector.load %arg3[%c0_3, %c0_4] : memref<1x128xf32, #tpu.memory_space<vmem>>, vector<1x128xf32>
    %4 = vector.broadcast %3 : vector<1x128xf32> to vector<128x128xf32>
    %5 = arith.addf %2, %4 : vector<128x128xf32>
    %cst_5 = arith.constant 0.000000e+00 : f32
    %6 = vector.broadcast %cst_5 : f32 to vector<128x128xf32>
    %7 = arith.maximumf %5, %6 : vector<128x128xf32>
    %c0_6 = arith.constant 0 : index
    %c0_7 = arith.constant 0 : index
    %8 = vector.load %arg4[%c0_6, %c0_7] : memref<128x256xf32, #tpu.memory_space<vmem>>, vector<128x256xf32>
    %cst_8 = arith.constant dense<0.000000e+00> : vector<128x256xf32>
    %9 = tpu.matmul %7, %8, %cst_8 {dimension_numbers = #tpu.dot_dimension_numbers<[1], [0], [0], [1], [0, 0, 1, 1], [], []>} : vector<128x128xf32>, vector<128x256xf32>, vector<128x256xf32> -> vector<128x256xf32>
    %c0_9 = arith.constant 0 : index
    %c0_10 = arith.constant 0 : index
    %10 = vector.load %arg5[%c0_9, %c0_10] : memref<1x256xf32, #tpu.memory_space<vmem>>, vector<1x256xf32>
    %11 = vector.broadcast %10 : vector<1x256xf32> to vector<128x256xf32>
    %12 = arith.addf %9, %11 : vector<128x256xf32>
    %cst_11 = arith.constant 0.000000e+00 : f32
    %13 = vector.broadcast %cst_11 : f32 to vector<128x256xf32>
    %14 = arith.maximumf %12, %13 : vector<128x256xf32>
    %c0_12 = arith.constant 0 : index
    %c0_13 = arith.constant 0 : index
    %15 = vector.load %arg6[%c0_12, %c0_13] : memref<1x256xf32, #tpu.memory_space<vmem>>, vector<1x256xf32>
    %cst_14 = arith.constant dense<0.000000e+00> : vector<1x128xf32>
    %16 = tpu.matmul %15, %14, %cst_14 {dimension_numbers = #tpu.dot_dimension_numbers<[1], [1], [0], [0], [0, 0, 1, 0], [], []>} : vector<1x256xf32>, vector<128x256xf32>, vector<1x128xf32> -> vector<1x128xf32>
    %c0_15 = arith.constant 0 : index
    %c0_16 = arith.constant 0 : index
    %17 = vector.load %arg7[%c0_15, %c0_16] : memref<1x1xf32, #tpu.memory_space<vmem>>, vector<1x1xf32>
    %18 = vector.broadcast %17 : vector<1x1xf32> to vector<1x128xf32>
    %19 = arith.addf %16, %18 : vector<1x128xf32>
    %c0_17 = arith.constant 0 : index
    %c0_18 = arith.constant 0 : index
    %20 = vector.load %arg8[%c0_17, %c0_18] : memref<1x128xf32, #tpu.memory_space<vmem>>, vector<1x128xf32>
    tpu.vector_store %arg8[%c0_17, %c0_18], %19 {strides = array<i32>} : memref<1x128xf32, #tpu.memory_space<vmem>>, vector<1x128xf32>,
    return
  }
  func.func @transform_0(%arg0: i32) -> (i32, i32) {
    %c0_i32 = arith.constant 0 : i32
    %c0_i32_0 = arith.constant 0 : i32
    return %arg0, %c0_i32 : i32, i32
  }
  func.func @transform_1(%arg0: i32) -> (i32, i32) {
    %c0_i32 = arith.constant 0 : i32
    %c0_i32_0 = arith.constant 0 : i32
    %c0_i32_1 = arith.constant 0 : i32
    return %c0_i32, %c0_i32_0 : i32, i32
  }
  func.func @transform_2(%arg0: i32) -> (i32, i32) {
    %c0_i32 = arith.constant 0 : i32
    %c0_i32_0 = arith.constant 0 : i32
    %c0_i32_1 = arith.constant 0 : i32
    return %c0_i32, %c0_i32_0 : i32, i32
  }
  func.func @transform_3(%arg0: i32) -> (i32, i32) {
    %c0_i32 = arith.constant 0 : i32
    %c0_i32_0 = arith.constant 0 : i32
    %c0_i32_1 = arith.constant 0 : i32
    return %c0_i32, %c0_i32_0 : i32, i32
  }
  func.func @transform_4(%arg0: i32) -> (i32, i32) {
    %c0_i32 = arith.constant 0 : i32
    %c0_i32_0 = arith.constant 0 : i32
    %c0_i32_1 = arith.constant 0 : i32
    return %c0_i32, %c0_i32_0 : i32, i32
  }
  func.func @transform_5(%arg0: i32) -> (i32, i32) {
    %c0_i32 = arith.constant 0 : i32
    %c0_i32_0 = arith.constant 0 : i32
    %c0_i32_1 = arith.constant 0 : i32
    return %c0_i32, %c0_i32_0 : i32, i32
  }
  func.func @transform_6(%arg0: i32) -> (i32, i32) {
    %c0_i32 = arith.constant 0 : i32
    %c0_i32_0 = arith.constant 0 : i32
    %c0_i32_1 = arith.constant 0 : i32
    return %c0_i32, %c0_i32_0 : i32, i32
  }
  func.func @transform_7(%arg0: i32) -> (i32, i32) {
    %c0_i32 = arith.constant 0 : i32
    %c0_i32_0 = arith.constant 0 : i32
    return %c0_i32, %arg0 : i32, i32
  }
}

</mosaic_0001>

<bundles_post_ra>
// kernel: tpu_custom_call.1
= control target key start
LH: loop header
LB: loop body
LE: loop exit
PB: predicated region body
PF: predicated region fallthrough
CT: control target
= control target key end

     0   :  { %s752_s0 = inlined_call_operand.vmem [shape: f32[128,16], index: 0, kind: input, shape index: {}]   ;;  %s753_s1 = inlined_call_operand.vmem [shape: f32[16,128], index: 1, kind: input, shape index: {}]   ;;  %s754_s2 = inlined_call_operand.vmem [shape: f32[1,128], index: 2, kind: input, shape index: {}]   ;;  %s755_s3 = inlined_call_operand.hbm [shape: f32[128,256], index: 3, kind: input, shape index: {}]   ;;  %s756_s4 = inlined_call_operand.vmem [shape: f32[1,256], index: 4, kind: input, shape index: {}]   ;;  %s757_s5 = inlined_call_operand.vmem [shape: f32[1,256], index: 5, kind: input, shape index: {}]   ;;  %s758_s6 = inlined_call_operand.<no memory space> [shape: f32[1,1], index: 6, kind: input, shape index: {}]   ;;  %s759_s7 = inlined_call_operand.hbm [shape: f32[1,128], index: 7, kind: output, shape index: {}]  }
   0x1   :  { %v12_v0 = vstv %s758_s6 }
   0x2   :  { %13 = vst [vmem:[#allocation2] sm:$0x1] %v12_v0 }
   0x3   :  { %14 = vsyncpa [#allocation4], 0 }
   0x4   :  { %15 = vsyncpa [#allocation5], 0  ;;  %s26_s28 = sshll.u32 %s755_s3, 4  ;;  %s559_s29 = smov [#allocation3]   ;;  %s27_s28 = int_to_ptr.hbm [resolvable:$true] %s26_s28 }
   0x5   :  { %s28_s30 = sshll.u32 %s559_s29, 4  ;;  %s560_s8 = smov 256   ;;  %s29_s30 = int_to_ptr.vmem [resolvable:$true] %s28_s30 }
   0x6   :  { %s561_s9 = smov 16  }
   0x7   :  { %34 = dma.hbm_to_vmem [thread:$0]  %s27_s28, 4096, %s29_s30, [#allocation4], %s560_s8, %s560_s8, %s561_s9  }
   0x8   :  { %555 = dma.done.wait [#allocation4], 4096  }
   0x9   :  { %556 = vsyncadd [#allocation4], 4294963200  ;;  %v62_v1 = vld [vmem:[%s753_s1 + $0x8] sm:$0xff]  ;;  %v61_v2 = vld [vmem:[%s753_s1] sm:$0xff]  ;;  %vm67_vm0 = vcmask 130048   ;;  %s458_s23 = sshll.u32 %s759_s7, 4  ;;  %s459_s23 = int_to_ptr.hbm [resolvable:$true] %s458_s23 }
   0xa   :  { %130 = vmatpush.msra.mxu0 %v62_v1  ;;  %v45_v3 = vld [vmem:[%s752_s0] sm:$0xff]  ;;  %v46_v4 = vld [vmem:[%s752_s0 + $0x8] sm:$0xff]  ;;  %v47_v5 = vld [vmem:[%s752_s0 + $0x10] sm:$0xff] }
   0xb   :  { %v48_v6 = vld [vmem:[%s752_s0 + $0x18] sm:$0xff]  ;;  %v49_v7 = vld [vmem:[%s752_s0 + $0x20] sm:$0xff]  ;;  %v50_v8 = vld [vmem:[%s752_s0 + $0x28] sm:$0xff] }
   0xc   :  { %131 = vmatpush.msra.mxu0 %v61_v2  ;;  %v51_v9 = vld [vmem:[%s752_s0 + $0x30] sm:$0xff]  ;;  %v52_v10 = vld [vmem:[%s752_s0 + $0x38] sm:$0xff]  ;;  %v53_v11 = vld [vmem:[%s752_s0 + $0x40] sm:$0xff] }
   0xd   :  { %468 = vmatmul.msk.f32.vlgmr.msra.gmra.mxu0 %vm67_vm0, %v45_v3  ;;  %v227_v12 = vld [vmem:[#allocation3 + $0xf0] sm:$0xff]  ;;  %v228_v13 = vld [vmem:[#allocation3 + $0xf8] sm:$0xff]  ;;  %v225_v14 = vld [vmem:[#allocation3 + $0xe0] sm:$0xff] }
   0xe   :  { %235 = vmatpush.msrb.mxu0 %v227_v12  ;;  %300 = vmatpush.msra.mxu2 %v228_v13  ;;  %v226_v15 = vld [vmem:[#allocation3 + $0xe8] sm:$0xff]  ;;  %v223_v16 = vld [vmem:[#allocation3 + $0xd0] sm:$0xff]  ;;  %v224_v17 = vld [vmem:[#allocation3 + $0xd8] sm:$0xff] }
   0xf   :  { %484 = vmatpush.msra.mxu1 %v227_v12  ;;  %v54_v18 = vld [vmem:[%s752_s0 + $0x48] sm:$0xff]  ;;  %v219_v21 = vld [vmem:[#allocation3 + $0xb0] sm:$0xff]  ;;  %v220_v22 = vld [vmem:[#allocation3 + $0xb8] sm:$0xff] }
  0x10   :  { %236 = vmatpush.msrb.mxu0 %v225_v14  ;;  %301 = vmatpush.msra.mxu2 %v226_v15  ;;  %v221_v19 = vld [vmem:[#allocation3 + $0xc0] sm:$0xff]  ;;  %v222_v20 = vld [vmem:[#allocation3 + $0xc8] sm:$0xff]  ;;  %v215_v25 = vld [vmem:[#allocation3 + $0x90] sm:$0xff] }
  0x11   :  { %485 = vmatpush.msra.mxu1 %v225_v14  ;;  %v217_v23 = vld [vmem:[#allocation3 + $0xa0] sm:$0xff]  ;;  %v218_v24 = vld [vmem:[#allocation3 + $0xa8] sm:$0xff]  ;;  %v216_v26 = vld [vmem:[#allocation3 + $0x98] sm:$0xff] }
  0x12   :  { %237 = vmatpush.msrb.mxu0 %v223_v16  ;;  %302 = vmatpush.msra.mxu2 %v224_v17  ;;  %v55_v27 = vld [vmem:[%s752_s0 + $0x50] sm:$0xff]  ;;  %v213_v28 = vld [vmem:[#allocation3 + $0x80] sm:$0xff]  ;;  %v212_v31 = vld [vmem:[#allocation3 + $0x78] sm:$0xff] }
  0x13   :  { %486 = vmatpush.msra.mxu1 %v223_v16  ;;  %v214_v29 = vld [vmem:[#allocation3 + $0x88] sm:$0xff]  ;;  %v211_v30 = vld [vmem:[#allocation3 + $0x70] sm:$0xff]  ;;  %v209_v32 = vld [vmem:[#allocation3 + $0x60] sm:$0xff] }
  0x14   :  { %238 = vmatpush.msrb.mxu0 %v221_v19  ;;  %303 = vmatpush.msra.mxu2 %v222_v20  ;;  %v210_v33 = vld [vmem:[#allocation3 + $0x68] sm:$0xff]  ;;  %v207_v34 = vld [vmem:[#allocation3 + $0x50] sm:$0xff]  ;;  %v208_v35 = vld [vmem:[#allocation3 + $0x58] sm:$0xff] }
  0x15   :  { %469 = vmatmul.msk.f32.gmra.mxu0 %vm67_vm0, %v46_v4  ;;  %487 = vmatpush.msra.mxu1 %v221_v19  ;;  %v56_v36 = vld [vmem:[%s752_s0 + $0x58] sm:$0xff]  ;;  %v205_v37 = vld [vmem:[#allocation3 + $0x40] sm:$0xff]  ;;  %v206_v38 = vld [vmem:[#allocation3 + $0x48] sm:$0xff] }
  0x16   :  { %239 = vmatpush.msrb.mxu0 %v219_v21  ;;  %304 = vmatpush.msra.mxu2 %v220_v22  ;;  %v203_v39 = vld [vmem:[#allocation3 + $0x30] sm:$0xff]  ;;  %v204_v40 = vld [vmem:[#allocation3 + $0x38] sm:$0xff]  ;;  %v201_v41 = vld [vmem:[#allocation3 + $0x20] sm:$0xff] }
  0x17   :  { %488 = vmatpush.msra.mxu1 %v219_v21  ;;  %v202_v42 = vld [vmem:[#allocation3 + $0x28] sm:$0xff]  ;;  %v57_v43 = vld [vmem:[%s752_s0 + $0x60] sm:$0xff]  ;;  %v199_v44 = vld [vmem:[#allocation3 + $0x10] sm:$0xff] }
  0x18   :  { %240 = vmatpush.msrb.mxu0 %v217_v23  ;;  %305 = vmatpush.msra.mxu2 %v218_v24  ;;  %v200_v45 = vld [vmem:[#allocation3 + $0x18] sm:$0xff]  ;;  %v197_v46 = vld [vmem:[#allocation3] sm:$0xff]  ;;  %v198_v47 = vld [vmem:[#allocation3 + $0x8] sm:$0xff] }
  0x19   :  { %489 = vmatpush.msra.mxu1 %v217_v23  ;;  %v58_v48 = vld [vmem:[%s752_s0 + $0x68] sm:$0xff]  ;;  %v59_v49 = vld [vmem:[%s752_s0 + $0x70] sm:$0xff]  ;;  %v60_v50 = vld [vmem:[%s752_s0 + $0x78] sm:$0xff] }
  0x1a   :  { %241 = vmatpush.msrb.mxu0 %v215_v25  ;;  %306 = vmatpush.msra.mxu2 %v216_v26  ;;  %v683_v51 = vld [vmem:[%s754_s2] ss:$0 sm:$0xff] }
  0x1b   :  { %490 = vmatpush.msra.mxu1 %v215_v25 }
  0x1c   :  { %242 = vmatpush.msrb.mxu0 %v213_v28  ;;  %307 = vmatpush.msra.mxu2 %v214_v29 }
  0x1d   :  { %470 = vmatmul.msk.f32.gmra.mxu0 %vm67_vm0, %v47_v5  ;;  %491 = vmatpush.msra.mxu1 %v213_v28 }
  0x1e   :  { %243 = vmatpush.msrb.mxu0 %v211_v30  ;;  %308 = vmatpush.msra.mxu2 %v212_v31 }
  0x1f   :  { %492 = vmatpush.msra.mxu1 %v211_v30 }
  0x20   :  { %244 = vmatpush.msrb.mxu0 %v209_v32  ;;  %309 = vmatpush.msra.mxu2 %v210_v33 }
  0x21   :  { %493 = vmatpush.msra.mxu1 %v209_v32 }
  0x22   :  { %245 = vmatpush.msrb.mxu0 %v207_v34  ;;  %310 = vmatpush.msra.mxu2 %v208_v35 }
  0x23   :  { %494 = vmatpush.msra.mxu1 %v207_v34 }
  0x24   :  { %246 = vmatpush.msrb.mxu0 %v205_v37  ;;  %311 = vmatpush.msra.mxu2 %v206_v38 }
  0x25   :  { %471 = vmatmul.msk.f32.gmra.mxu0 %vm67_vm0, %v48_v6  ;;  %495 = vmatpush.msra.mxu1 %v205_v37 }
  0x26   :  { %247 = vmatpush.msrb.mxu0 %v203_v39  ;;  %312 = vmatpush.msra.mxu2 %v204_v40 }
  0x27   :  { %496 = vmatpush.msra.mxu1 %v203_v39 }
  0x28   :  { %248 = vmatpush.msrb.mxu0 %v201_v41  ;;  %313 = vmatpush.msra.mxu2 %v202_v42 }
  0x29   :  { %497 = vmatpush.msra.mxu1 %v201_v41 }
  0x2a   :  { %249 = vmatpush.msrb.mxu0 %v199_v44  ;;  %314 = vmatpush.msra.mxu2 %v200_v45 }
  0x2b   :  { %498 = vmatpush.msra.mxu1 %v199_v44 }
  0x2c   :  { %250 = vmatpush.msrb.mxu0 %v197_v46  ;;  %315 = vmatpush.msra.mxu2 %v198_v47 }
  0x2d   :  { %472 = vmatmul.msk.f32.gmra.mxu0 %vm67_vm0, %v49_v7  ;;  %499 = vmatpush.msra.mxu1 %v197_v46 }
  0x35   :  { %473 = vmatmul.msk.f32.gmra.mxu0 %vm67_vm0, %v50_v8 }
  0x3d   :  { %474 = vmatmul.msk.f32.gmra.mxu0 %vm67_vm0, %v51_v9 }
  0x45   :  { %475 = vmatmul.msk.f32.gmra.mxu0 %vm67_vm0, %v52_v10 }
  0x4d   :  { %476 = vmatmul.msk.f32.gmra.mxu0 %vm67_vm0, %v53_v11 }
  0x55   :  { %477 = vmatmul.msk.f32.gmra.mxu0 %vm67_vm0, %v54_v18 }
  0x5d   :  { %478 = vmatmul.msk.f32.gmra.mxu0 %vm67_vm0, %v55_v27 }
  0x65   :  { %479 = vmatmul.msk.f32.gmra.mxu0 %vm67_vm0, %v56_v36 }
  0x6d   :  { %480 = vmatmul.msk.f32.gmra.mxu0 %vm67_vm0, %v57_v43 }
  0x75   :  { %481 = vmatmul.msk.f32.gmra.mxu0 %vm67_vm0, %v58_v48 }
  0x7d   :  { %482 = vmatmul.msk.f32.gmra.mxu0 %vm67_vm0, %v59_v49 }
  0x85   :  { %483 = vmatmul.msk.f32.gmra.mxu0 %vm67_vm0, %v60_v50 }
  0x8a   :  { %v133_v52 = vpop.f32.mrf.mxu0 }
  0x8b   :  { %v134_v53 = vadd.f32 %v683_v51, %v133_v52 }
  0x8d   :  { %v181_v54 = vmax.f32 %v134_v53, 0.0 }
  0x8f   :  { %251 = vmatmul.f32.vlgmr.msrb.gmra.mxu0 %v181_v54  ;;  %316 = vmatmul.f32.vlgmr.msra.gmra.mxu2 %v181_v54 }
  0x92   :  { %v136_v55 = vpop.f32.mrf.mxu0 }
  0x93   :  { %v137_v56 = vadd.f32 %v683_v51, %v136_v55 }
  0x95   :  { %v182_v57 = vmax.f32 %v137_v56, 0.0 }
  0x97   :  { %254 = vmatmul.f32.vlgmr.msra.gmra.mxu1 %v182_v57  ;;  %319 = vmatmul.f32.gmra.mxu2 %v182_v57 }
  0x9a   :  { %v139_v58 = vpop.f32.mrf.mxu0 }
  0x9b   :  { %v140_v59 = vadd.f32 %v683_v51, %v139_v58 }
  0x9d   :  { %v183_v60 = vmax.f32 %v140_v59, 0.0  ;;  %v229_v59 = vld [vmem:[%s756_s4] sm:$0x3] }
  0x9f   :  { %257 = vmatmul.f32.gmra.mxu1 %v183_v60  ;;  %322 = vmatmul.f32.gmra.mxu2 %v183_v60 }
  0xa2   :  { %v142_v61 = vpop.f32.mrf.mxu0 }
  0xa3   :  { %v143_v62 = vadd.f32 %v683_v51, %v142_v61  ;;  %v231_v61 = vperm.slane %v229_v59, 0 }
  0xa5   :  { %v184_v63 = vmax.f32 %v143_v62, 0.0 }
  0xa7   :  { %260 = vmatmul.f32.gmra.mxu1 %v184_v63  ;;  %325 = vmatmul.f32.gmra.mxu2 %v184_v63 }
  0xaa   :  { %v145_v0 = vpop.f32.mrf.mxu0 }
  0xab   :  { %v146_v1 = vadd.f32 %v683_v51, %v145_v0 }
  0xad   :  { %v185_v2 = vmax.f32 %v146_v1, 0.0 }
  0xaf   :  { %263 = vmatmul.f32.gmra.mxu1 %v185_v2  ;;  %328 = vmatmul.f32.gmra.mxu2 %v185_v2 }
  0xb2   :  { %v148_v3 = vpop.f32.mrf.mxu0 }
  0xb3   :  { %v149_v4 = vadd.f32 %v683_v51, %v148_v3 }
  0xb5   :  { %v186_v5 = vmax.f32 %v149_v4, 0.0 }
  0xb7   :  { %266 = vmatmul.f32.gmra.mxu1 %v186_v5  ;;  %331 = vmatmul.f32.gmra.mxu2 %v186_v5 }
  0xba   :  { %v151_v6 = vpop.f32.mrf.mxu0 }
  0xbb   :  { %v152_v7 = vadd.f32 %v683_v51, %v151_v6 }
  0xbd   :  { %v187_v8 = vmax.f32 %v152_v7, 0.0 }
  0xbf   :  { %269 = vmatmul.f32.gmra.mxu1 %v187_v8  ;;  %334 = vmatmul.f32.gmra.mxu2 %v187_v8 }
  0xc2   :  { %v154_v9 = vpop.f32.mrf.mxu0 }
  0xc3   :  { %v155_v10 = vadd.f32 %v683_v51, %v154_v9 }
  0xc5   :  { %v188_v11 = vmax.f32 %v155_v10, 0.0 }
  0xc7   :  { %272 = vmatmul.f32.gmra.mxu1 %v188_v11  ;;  %337 = vmatmul.f32.gmra.mxu2 %v188_v11 }
  0xca   :  { %v157_v12 = vpop.f32.mrf.mxu0 }
  0xcb   :  { %v158_v13 = vadd.f32 %v683_v51, %v157_v12 }
  0xcd   :  { %v189_v14 = vmax.f32 %v158_v13, 0.0 }
  0xcf   :  { %275 = vmatmul.f32.gmra.mxu1 %v189_v14  ;;  %340 = vmatmul.f32.gmra.mxu2 %v189_v14 }
  0xd2   :  { %v160_v15 = vpop.f32.mrf.mxu0 }
  0xd3   :  { %v161_v16 = vadd.f32 %v683_v51, %v160_v15 }
  0xd5   :  { %v190_v17 = vmax.f32 %v161_v16, 0.0 }
  0xd7   :  { %278 = vmatmul.f32.gmra.mxu1 %v190_v17  ;;  %343 = vmatmul.f32.gmra.mxu2 %v190_v17 }
  0xda   :  { %v163_v18 = vpop.f32.mrf.mxu0 }
  0xdb   :  { %v164_v19 = vadd.f32 %v683_v51, %v163_v18 }
  0xdd   :  { %v191_v20 = vmax.f32 %v164_v19, 0.0 }
  0xdf   :  { %281 = vmatmul.f32.gmra.mxu1 %v191_v20  ;;  %346 = vmatmul.f32.gmra.mxu2 %v191_v20 }
  0xe2   :  { %v166_v21 = vpop.f32.mrf.mxu0 }
  0xe3   :  { %v167_v22 = vadd.f32 %v683_v51, %v166_v21 }
  0xe5   :  { %v192_v23 = vmax.f32 %v167_v22, 0.0 }
  0xe7   :  { %284 = vmatmul.f32.gmra.mxu1 %v192_v23  ;;  %349 = vmatmul.f32.gmra.mxu2 %v192_v23 }
  0xea   :  { %v169_v24 = vpop.f32.mrf.mxu0 }
  0xeb   :  { %v170_v25 = vadd.f32 %v683_v51, %v169_v24 }
  0xed   :  { %v193_v26 = vmax.f32 %v170_v25, 0.0 }
  0xef   :  { %287 = vmatmul.f32.gmra.mxu1 %v193_v26  ;;  %352 = vmatmul.f32.gmra.mxu2 %v193_v26 }
  0xf2   :  { %v172_v27 = vpop.f32.mrf.mxu0 }
  0xf3   :  { %v173_v28 = vadd.f32 %v683_v51, %v172_v27 }
  0xf5   :  { %v194_v29 = vmax.f32 %v173_v28, 0.0 }
  0xf7   :  { %290 = vmatmul.f32.gmra.mxu1 %v194_v29  ;;  %355 = vmatmul.f32.gmra.mxu2 %v194_v29 }
  0xfa   :  { %v175_v30 = vpop.f32.mrf.mxu0 }
  0xfb   :  { %v176_v31 = vadd.f32 %v683_v51, %v175_v30 }
  0xfd   :  { %v195_v32 = vmax.f32 %v176_v31, 0.0 }
  0xff   :  { %293 = vmatmul.f32.gmra.mxu1 %v195_v32  ;;  %358 = vmatmul.f32.gmra.mxu2 %v195_v32 }
 0x102   :  { %v178_v33 = vpop.f32.mrf.mxu0 }
 0x103   :  { %v179_v34 = vadd.f32 %v683_v51, %v178_v33 }
 0x105   :  { %v196_v35 = vmax.f32 %v179_v34, 0.0 }
 0x107   :  { %296 = vmatmul.f32.gmra.mxu1 %v196_v35  ;;  %361 = vmatmul.f32.gmra.mxu2 %v196_v35  ;;  %v232_v35 = vperm.slane %v229_v59, 1 }
 0x10c   :  { %v252_v33 = vpop.f32.mrf.mxu0 }
 0x112   :  { %v707_v39 = vpop.f32.mrf.mxu2 }
 0x114   :  { %v701_v36 = vpop.f32.mrf.mxu1 }
 0x115   :  { %v256_v31 = vadd.f32 %v701_v36, %v231_v61 }
 0x11a   :  { %v709_v41 = vpop.f32.mrf.mxu2 }
 0x11c   :  { %v703_v37 = vpop.f32.mrf.mxu1 }
 0x11d   :  { %v259_v29 = vadd.f32 %v703_v37, %v231_v61 }
 0x11f   :  { %v369_v32 = vmax.f32 %v259_v29, 0.0 }
 0x122   :  { %v711_v43 = vpop.f32.mrf.mxu2 }
 0x124   :  { %v705_v38 = vpop.f32.mrf.mxu1 }
 0x125   :  { %v262_v26 = vadd.f32 %v705_v38, %v231_v61 }
 0x127   :  { %v371_v30 = vmax.f32 %v262_v26, 0.0 }
 0x12a   :  { %v713_v46 = vpop.f32.mrf.mxu2 }
 0x12c   :  { %v264_v40 = vpop.f32.mrf.mxu1 }
 0x12d   :  { %v265_v24 = vadd.f32 %v264_v40, %v231_v61  ;;  %v367_v40 = vmax.f32 %v256_v31, 0.0 }
 0x12f   :  { %v373_v27 = vmax.f32 %v265_v24, 0.0 }
 0x132   :  { %v715_v48 = vpop.f32.mrf.mxu2 }
 0x134   :  { %v267_v42 = vpop.f32.mrf.mxu1 }
 0x135   :  { %v268_v22 = vadd.f32 %v267_v42, %v231_v61  ;;  %v253_v42 = vadd.f32 %v252_v33, %v231_v61 }
 0x137   :  { %v375_v25 = vmax.f32 %v268_v22, 0.0 }
 0x13a   :  { %v717_v50 = vpop.f32.mrf.mxu2 }
 0x13c   :  { %v270_v44 = vpop.f32.mrf.mxu1 }
 0x13d   :  { %v271_v19 = vadd.f32 %v270_v44, %v231_v61 }
 0x13f   :  { %v377_v23 = vmax.f32 %v271_v19, 0.0 }
 0x142   :  { %v719_v52 = vpop.f32.mrf.mxu2 }
 0x144   :  { %v273_v45 = vpop.f32.mrf.mxu1 }
 0x145   :  { %v274_v17 = vadd.f32 %v273_v45, %v231_v61  ;;  %v365_v45 = vmax.f32 %v253_v42, 0.0 }
 0x147   :  { %v379_v20 = vmax.f32 %v274_v17, 0.0 }
 0x14a   :  { %v721_v55 = vpop.f32.mrf.mxu2 }
 0x14c   :  { %v276_v47 = vpop.f32.mrf.mxu1 }
 0x14d   :  { %v277_v14 = vadd.f32 %v276_v47, %v231_v61 }
 0x14f   :  { %v381_v18 = vmax.f32 %v277_v14, 0.0 }
 0x152   :  { %v723_v57 = vpop.f32.mrf.mxu2 }
 0x154   :  { %v279_v49 = vpop.f32.mrf.mxu1 }
 0x155   :  { %v280_v12 = vadd.f32 %v279_v49, %v231_v61 }
 0x157   :  { %v383_v15 = vmax.f32 %v280_v12, 0.0  ;;  %v321_v12 = vadd.f32 %v709_v41, %v232_v35 }
 0x159   :  { %v368_v14 = vmax.f32 %v321_v12, 0.0 }
 0x15a   :  { %v728_v60 = vpop.f32.mrf.mxu2 }
 0x15b   :  { %v345_v59 = vadd.f32 %v728_v60, %v232_v35  ;;  %v398_v60 = vld [vmem:[#allocation2] sm:$0x1] }
 0x15c   :  { %v282_v51 = vpop.f32.mrf.mxu1 }
 0x15d   :  { %v283_v10 = vadd.f32 %v282_v51, %v231_v61 }
 0x15f   :  { %v385_v13 = vmax.f32 %v283_v10, 0.0 }
 0x162   :  { %v730_v2 = vpop.f32.mrf.mxu2 }
 0x164   :  { %v285_v53 = vpop.f32.mrf.mxu1 }
 0x165   :  { %v286_v7 = vadd.f32 %v285_v53, %v231_v61 }
 0x167   :  { %v387_v11 = vmax.f32 %v286_v7, 0.0  ;;  %v333_v7 = vadd.f32 %v717_v50, %v232_v35  ;;  %v318_v50 = vadd.f32 %v707_v39, %v232_v35 }
 0x16a   :  { %v350_v9 = vpop.f32.mrf.mxu2 }
 0x16b   :  { %v351_v36 = vadd.f32 %v350_v9, %v232_v35  ;;  %v376_v9 = vmax.f32 %v333_v7, 0.0 }
 0x16c   :  { %v288_v54 = vpop.f32.mrf.mxu1 }
 0x16d   :  { %v289_v5 = vadd.f32 %v288_v54, %v231_v61 }
 0x16f   :  { %v389_v8 = vmax.f32 %v289_v5, 0.0 }
 0x172   :  { %v353_v16 = vpop.f32.mrf.mxu2 }
 0x173   :  { %v354_v51 = vadd.f32 %v353_v16, %v232_v35 }
 0x174   :  { %v291_v56 = vpop.f32.mrf.mxu1 }
 0x175   :  { %v292_v3 = vadd.f32 %v291_v56, %v231_v61  ;;  %v390_v54 = vmax.f32 %v354_v51, 0.0  ;;  %v348_v56 = vadd.f32 %v730_v2, %v232_v35  ;;  %v336_v2 = vadd.f32 %v719_v52, %v232_v35 }
 0x176   :  { %v324_v52 = vadd.f32 %v711_v43, %v232_v35 }
 0x177   :  { %v391_v6 = vmax.f32 %v292_v3, 0.0  ;;  %v339_v3 = vadd.f32 %v721_v55, %v232_v35  ;;  %v327_v55 = vadd.f32 %v713_v46, %v232_v35 }
 0x179   :  { %v380_v5 = vmax.f32 %v339_v3, 0.0 }
 0x17a   :  { %v356_v21 = vpop.f32.mrf.mxu2 }
 0x17b   :  { %v357_v49 = vadd.f32 %v356_v21, %v232_v35 }
 0x17c   :  { %v294_v58 = vpop.f32.mrf.mxu1 }
 0x17d   :  { %v295_v0 = vadd.f32 %v294_v58, %v231_v61  ;;  %v392_v53 = vmax.f32 %v357_v49, 0.0  ;;  %v388_v58 = vmax.f32 %v351_v36, 0.0 }
 0x17f   :  { %v393_v4 = vmax.f32 %v295_v0, 0.0  ;;  %v342_v0 = vadd.f32 %v723_v57, %v232_v35  ;;  %v330_v57 = vadd.f32 %v715_v48, %v232_v35 }
 0x181   :  { %v374_v10 = vmax.f32 %v330_v57, 0.0 }
 0x182   :  { %v359_v28 = vpop.f32.mrf.mxu2 }
 0x183   :  { %v360_v38 = vadd.f32 %v359_v28, %v232_v35 }
 0x184   :  { %v297_v62 = vpop.f32.mrf.mxu1 }
 0x185   :  { %v298_v63 = vadd.f32 %v297_v62, %v231_v61  ;;  %v394_v37 = vmax.f32 %v360_v38, 0.0  ;;  %v386_v61 = vmax.f32 %v348_v56, 0.0  ;;  %v397_v62 = vld [vmem:[%s757_s5] sm:$0x3]  ;;  %s563_s5 = smov [#allocation6]  }
 0x186   :  { %v407_v48 = vperm.slane %v397_v62, 1  ;;  %s456_s20 = sshll.u32 %s563_s5, 4  ;;  %s457_s20 = int_to_ptr.vmem [resolvable:$true] %s456_s20 }
 0x187   :  { %v395_v1 = vmax.f32 %v298_v63, 0.0  ;;  %v406_v63 = vperm.slane %v397_v62, 0 }
 0x189   :  { %410 = vmatpush.xpose.msra.mxu3 %v395_v1  ;;  %v384_v1 = vmax.f32 %v345_v59, 0.0 }
 0x18a   :  { %v362_v34 = vpop.f32.mrf.mxu2 }
 0x18b   :  { %v363_v44 = vadd.f32 %v362_v34, %v232_v35 }
 0x18d   :  { %411 = vmatpush.xpose.msra.mxu3 %v393_v4  ;;  %v396_v47 = vmax.f32 %v363_v44, 0.0  ;;  %v382_v4 = vmax.f32 %v342_v0, 0.0 }
 0x191   :  { %412 = vmatpush.xpose.msra.mxu3 %v391_v6  ;;  %v562_v6 = vmov 0  }
 0x192   :  { %505 = vset.pattern.permute.xlu0 %v562_v6 }
 0x193   :  { %401 = vperm.xlu0 %505, %v398_v60  }
 0x195   :  { %413 = vmatpush.xpose.msra.mxu3 %v389_v8  ;;  %v378_v8 = vmax.f32 %v336_v2, 0.0 }
 0x199   :  { %414 = vmatpush.xpose.msra.mxu3 %v387_v11  ;;  %v372_v11 = vmax.f32 %v327_v55, 0.0 }
 0x19d   :  { %415 = vmatpush.xpose.msra.mxu3 %v385_v13  ;;  %v370_v13 = vmax.f32 %v324_v52, 0.0 }
 0x1a1   :  { %416 = vmatpush.xpose.msra.mxu3 %v383_v15  ;;  %v366_v15 = vmax.f32 %v318_v50, 0.0 }
 0x1a5   :  { %417 = vmatpush.xpose.msra.mxu3 %v381_v18 }
 0x1a9   :  { %418 = vmatpush.xpose.msra.mxu3 %v379_v20 }
 0x1ad   :  { %419 = vmatpush.xpose.msra.mxu3 %v377_v23 }
 0x1b1   :  { %420 = vmatpush.xpose.msra.mxu3 %v375_v25 }
 0x1b5   :  { %421 = vmatpush.xpose.msra.mxu3 %v373_v27 }
 0x1b9   :  { %422 = vmatpush.xpose.msra.mxu3 %v371_v30 }
 0x1bd   :  { %423 = vmatpush.xpose.msra.mxu3 %v369_v32 }
 0x1c1   :  { %424 = vmatpush.xpose.msra.mxu3 %v367_v40 }
 0x1c5   :  { %425 = vmatpush.xpose.msra.mxu3 %v365_v45 }
 0x1c8   :  { %426 = vmatmul.f32.vlgmr.msra.gmra.mxu3 %v406_v63 }
 0x1c9   :  { %430 = vmatpush.xpose.msrb.mxu3 %v396_v47 }
 0x1cd   :  { %431 = vmatpush.xpose.msrb.mxu3 %v394_v37 }
 0x1d1   :  { %432 = vmatpush.xpose.msrb.mxu3 %v392_v53 }
 0x1d5   :  { %433 = vmatpush.xpose.msrb.mxu3 %v390_v54 }
 0x1d9   :  { %434 = vmatpush.xpose.msrb.mxu3 %v388_v58 }
 0x1dd   :  { %435 = vmatpush.xpose.msrb.mxu3 %v386_v61 }
 0x1e1   :  { %436 = vmatpush.xpose.msrb.mxu3 %v384_v1 }
 0x1e5   :  { %437 = vmatpush.xpose.msrb.mxu3 %v382_v4 }
 0x1e9   :  { %438 = vmatpush.xpose.msrb.mxu3 %v380_v5 }
 0x1ed   :  { %439 = vmatpush.xpose.msrb.mxu3 %v378_v8 }
 0x1f1   :  { %440 = vmatpush.xpose.msrb.mxu3 %v376_v9 }
 0x1f5   :  { %441 = vmatpush.xpose.msrb.mxu3 %v374_v10 }
 0x1f9   :  { %442 = vmatpush.xpose.msrb.mxu3 %v372_v11 }
 0x1fd   :  { %443 = vmatpush.xpose.msrb.mxu3 %v370_v13 }
 0x201   :  { %444 = vmatpush.xpose.msrb.mxu3 %v368_v14 }
 0x205   :  { %445 = vmatpush.xpose.msrb.mxu3 %v366_v15  ;;  %v402_v46 = vpop.permute.xlu0 %401 }
 0x206   :  { %v404_v17 = vperm.slane %v402_v46, 0 }
 0x208   :  { %446 = vmatmul.f32.vlgmr.msrb.gmra.mxu3 %v407_v48 }
 0x24b   :  { %v427_v16 = vpop.f32.mrf.mxu3 }
 0x24c   :  { %v428_v41 = vadd.f32 %v427_v16, %v404_v17 }
 0x28b   :  { %v447_v43 = vpop.f32.mrf.mxu3 }
 0x28c   :  { %v448_v18 = vadd.f32 %v447_v43, %v428_v41 }
 0x28e   :  { %450 = vst [vmem:[#allocation6] sm:$0x1] %v448_v18 }
 0x28f   :  { %461 = dma.vmem_to_hbm [thread:$0]  %s457_s20, 16, %s459_s23, [#allocation5]  }
 0x290   :  { %557 = dma.done.wait [#allocation5], 16  }
 0x291   :  { %558 = vsyncadd [#allocation5], 4294967280 }
 0x292   :  { %466 = vsyncpa [#allocation4], 1 }
 0x293   :  { %467 = vsyncpa [#allocation5], 1 }

</bundles_post_ra>
